<compile_context>
chip_gen: v6e
topology: v6e:2x2x1
jax: 0.10.0
libtpu: 0.0.40
codegen_flags: <defaults>
</compile_context>

<pallas_src>
import functools

import jax
import jax.numpy as jnp
from jax.experimental import pallas as pl
from jax.experimental.pallas import tpu as pltpu


def _vmem_budget_bytes():
    """(per-pipeline-buffer adj budget, scoped vmem limit) for this chip."""
    try:
        cap = pltpu.get_tpu_info().vmem_capacity_bytes
    except Exception:  # conservative fallback if the query is unavailable
        cap = 64 * 1024 * 1024
    if cap >= 100 * 1024 * 1024:                    # v5e / v6e: 128 MiB VMEM
        return 20 * 1024 * 1024, 96 * 1024 * 1024
    return 12 * 1024 * 1024, 48 * 1024 * 1024       # v7x: 64 MiB VMEM


def _choose_tiles(n, adj_itemsize, rhs_row_bytes, adj_budget_bytes,
                  tile_m_req, tile_k_req):
    """Pick (tile_m, tile_k): byte-accurate, (8/16,128)-aligned, >= 2 M tiles."""
    # Sub-32-bit dtypes pack along sublanes: 16-row alignment avoids packed
    # relayout for bf16 adj.
    align = 16 if adj_itemsize < 4 else 8

    tile_m = min(tile_m_req, n)
    if tile_m < n:
        tile_m = max(align, (tile_m // align) * align)
    # Guarantee >= 2 row tiles so both v7x TensorCores get work along the
    # "parallel" M axis (costs one extra ~0.35us grid step; no-op on 1-TC).
    if n > align and pl.cdiv(n, tile_m) < 2:
        tile_m = max(align, (((n + 1) // 2) // align) * align)

    if tile_k_req is not None:
        tile_k = min(tile_k_req, n)
        if tile_k < n:
            assert tile_k % 128 == 0, "explicit tile_k must be a multiple of 128"
        return tile_m, tile_k

    # Prefer a single full-N K slab (no accumulator, no K grid axis) whenever
    # both the adj slab and the full RHS fit the per-buffer budget.
    if (tile_m * n * adj_itemsize <= adj_budget_bytes
            and n * rhs_row_bytes <= adj_budget_bytes):
        return tile_m, n
    # Otherwise K-tile with the largest multiple-of-128 block that fits; the
    # wrapper zero-pads the contraction dim if tile_k doesn't divide N.
    for cand in (4096, 2048, 1024, 512, 256, 128):
        if cand < n and tile_m * cand * adj_itemsize <= adj_budget_bytes:
            return tile_m, cand
    return tile_m, 128


def _adj_block_spec(tile_m, tile_k):
    """adj BlockSpec for the K-tiled path (deeper pipeline for small blocks)."""
    index_map = lambda i, k: (i, k)
    if tile_k <= 256 and hasattr(pl, "Buffered"):
        # Small adj blocks at v6e/v7x HBM bandwidth can leave DMA issue latency
        # exposed at the default pipeline depth of 2; a third buffer is cheap
        # inside the raised VMEM budget.
        try:
            return pl.BlockSpec((tile_m, tile_k), index_map,
                                pipeline_mode=pl.Buffered(3))
        except TypeError:  # older jax without pipeline_mode=
            pass
    return pl.BlockSpec((tile_m, tile_k), index_map)


# --------------------------- kernels ---------------------------------------


def _gcn_r2l_single(adj_ref, xw_ref, out_ref):
    """adj_tile @ (x @ w): single K step -> straight store, no accumulator."""
    out_ref[...] = jnp.dot(adj_ref[...], xw_ref[...],
                           preferred_element_type=jnp.float32
                           ).astype(out_ref.dtype)


def _gcn_l2r_single(adj_ref, x_ref, w_ref, out_ref):
    """(adj_tile @ x) @ w: single K step -> straight store, no accumulator."""
    ax = jnp.dot(adj_ref[...], x_ref[...], preferred_element_type=jnp.float32)
    out_ref[...] = jnp.dot(ax, w_ref[...].astype(jnp.float32),
                           preferred_element_type=jnp.float32
                           ).astype(out_ref.dtype)


def _gcn_r2l_acc(adj_ref, xw_ref, out_ref, acc_ref, *, tile_k, rhs_resident):
    """adj @ (x @ w) with the contraction tiled along K (f32 accumulator)."""
    k = pl.program_id(1)

    @pl.when(k == 0)
    def _():
        acc_ref[...] = jnp.zeros_like(acc_ref)

    if rhs_resident:
        k0 = pl.multiple_of(k * tile_k, 128)
        rhs = xw_ref[pl.ds(k0, tile_k), :]       # resident RHS, slice K window
    else:
        rhs = xw_ref[...]
    acc_ref[...] += jnp.dot(adj_ref[...], rhs,
                            preferred_element_type=jnp.float32)

    @pl.when(k == pl.num_programs(1) - 1)
    def _():
        out_ref[...] = acc_ref[...].astype(out_ref.dtype)


def _gcn_l2r_acc(adj_ref, x_ref, w_ref, out_ref, acc_ref, *,
                 tile_k, rhs_resident):
    """(adj @ x) @ w with the adj/x contraction tiled along K."""
    k = pl.program_id(1)

    @pl.when(k == 0)
    def _():
        acc_ref[...] = jnp.zeros_like(acc_ref)

    if rhs_resident:
        k0 = pl.multiple_of(k * tile_k, 128)
        rhs = x_ref[pl.ds(k0, tile_k), :]
    else:
        rhs = x_ref[...]
    acc_ref[...] += jnp.dot(adj_ref[...], rhs,
                            preferred_element_type=jnp.float32)

    @pl.when(k == pl.num_programs(1) - 1)
    def _():
        # Tiny (tile_m, F_in) @ (F_in, F_out) epilogue, once per row tile.
        out_ref[...] = jnp.dot(acc_ref[...], w_ref[...].astype(jnp.float32),
                               preferred_element_type=jnp.float32
                               ).astype(out_ref.dtype)


# --------------------------- wrapper ----------------------------------------


def simple_gcn_layer(adj, x, w, *, left_to_right=None, tile_m=256, tile_k=None):
    """Pallas TPU implementation of simple_gcn_layer.forward.

    Returns (adj, adj @ x @ w), mirroring the PyTorch module's output tuple.
    `left_to_right=None` auto-selects the cheaper compute order.
    """
    n, n2 = adj.shape
    assert n == n2, "adjacency must be square"
    n_x, f_in = x.shape
    assert n_x == n
    f_in_w, f_out = w.shape
    assert f_in_w == f_in

    out_dtype = jnp.result_type(adj.dtype, x.dtype, w.dtype)

    # Auto-select compute order (mathematically identical up to fp reorder):
    # r2l (precompute x @ w) whenever it does not increase MXU / DMA work.
    if left_to_right is None:
        left_to_right = f_out > f_in

    if left_to_right:
        rhs, f_rhs, f_acc = x, f_in, f_in
    else:
        # Hoist the tiny x @ w (N x F_out) out of the N^2 adj loop.
        rhs = jnp.dot(x, w, preferred_element_type=jnp.float32)
        f_rhs = f_acc = f_out

    # Run the big matmul at adj's storage precision: cast only the small RHS
    # operand to match adj (never adj itself -- a per-call adj cast would add
    # ~2x HBM traffic). In-kernel accumulation stays f32 either way.
    if rhs.dtype != adj.dtype:
        rhs = rhs.astype(adj.dtype)

    adj_itemsize = jnp.dtype(adj.dtype).itemsize
    rhs_row_bytes = f_rhs * jnp.dtype(rhs.dtype).itemsize
    adj_budget, vmem_limit = _vmem_budget_bytes()
    tile_m, tile_k = _choose_tiles(n, adj_itemsize, rhs_row_bytes, adj_budget,
                                   tile_m, tile_k)

    m_tiles = pl.cdiv(n, tile_m)        # boundary M tile: masked writeback
    k_tiles = pl.cdiv(n, tile_k)
    n_k = k_tiles * tile_k

    adj_in, rhs_in = adj, rhs
    if n_k != n:
        # Zero-pad the contraction dim (exact: padded zeros contribute 0);
        # only reached on the K-tiled large-N path when tile_k doesn't divide N.
        adj_in = jnp.pad(adj, ((0, 0), (0, n_k - n)))
        rhs_in = jnp.pad(rhs, ((0, n_k - n), (0, 0)))

    out_shape = jax.ShapeDtypeStruct((n, f_out), out_dtype)
    # Note: F_out < 128 lowers the final store to masked vst; output bytes are
    # tiny vs. adj here, so lane-dense output staging is only worth it if a
    # profile shows exposed writeback.

    if k_tiles == 1:
        # ---------------- single-K fast path: 1-D grid, no accumulator ------
        params = pltpu.CompilerParams(dimension_semantics=("parallel",),
                                      vmem_limit_bytes=vmem_limit)
        adj_spec = pl.BlockSpec((tile_m, n_k), lambda i: (i, 0))
        rhs_spec = pl.BlockSpec((n_k, f_rhs), lambda i: (0, 0))
        out_spec = pl.BlockSpec((tile_m, f_out), lambda i: (i, 0))
        if left_to_right:
            out = pl.pallas_call(
                _gcn_l2r_single, out_shape=out_shape, grid=(m_tiles,),
                in_specs=[adj_spec, rhs_spec,
                          pl.BlockSpec((f_in, f_out), lambda i: (0, 0))],
                out_specs=out_spec, compiler_params=params,
            )(adj_in, rhs_in, w)
        else:
            out = pl.pallas_call(
                _gcn_r2l_single, out_shape=out_shape, grid=(m_tiles,),
                in_specs=[adj_spec, rhs_spec],
                out_specs=out_spec, compiler_params=params,
            )(adj_in, rhs_in)
    else:
        # ---------------- K-tiled path: f32 VMEM accumulator over K ---------
        params = pltpu.CompilerParams(
            dimension_semantics=("parallel", "arbitrary"),
            vmem_limit_bytes=vmem_limit)
        adj_spec = _adj_block_spec(tile_m, tile_k)
        # Keep the (small) RHS VMEM-resident across all grid steps instead of
        # re-DMAing it for every (i, k) step; slice the K window in-kernel.
        rhs_resident = n_k * rhs_row_bytes <= adj_budget
        if rhs_resident:
            rhs_spec = pl.BlockSpec((n_k, f_rhs), lambda i, k: (0, 0))
        else:
            rhs_spec = pl.BlockSpec((tile_k, f_rhs), lambda i, k: (k, 0))
        out_spec = pl.BlockSpec((tile_m, f_out), lambda i, k: (i, 0))
        scratch = [pltpu.VMEM((tile_m, f_acc), jnp.float32)]
        if left_to_right:
            kernel = functools.partial(_gcn_l2r_acc, tile_k=tile_k,
                                       rhs_resident=rhs_resident)
            out = pl.pallas_call(
                kernel, out_shape=out_shape, grid=(m_tiles, k_tiles),
                in_specs=[adj_spec, rhs_spec,
                          pl.BlockSpec((f_in, f_out), lambda i, k: (0, 0))],
                out_specs=out_spec, scratch_shapes=scratch,
                compiler_params=params,
            )(adj_in, rhs_in, w)
        else:
            kernel = functools.partial(_gcn_r2l_acc, tile_k=tile_k,
                                       rhs_resident=rhs_resident)
            out = pl.pallas_call(
                kernel, out_shape=out_shape, grid=(m_tiles, k_tiles),
                in_specs=[adj_spec, rhs_spec],
                out_specs=out_spec, scratch_shapes=scratch,
                compiler_params=params,
            )(adj_in, rhs_in)

    # Match the PyTorch module's (adj, adj_x_w) tuple; adj is the caller's
    # original array, dtype and values untouched.
    return adj, out


if __name__ == "__main__":
    # Shapes implied by the module: adj [N, N], x [N, input_size],
    # w [input_size, output_size].
    N, F_IN, F_OUT = 256, 32, 16

    key = jax.random.PRNGKey(0)
    k_adj, k_x, k_w = jax.random.split(key, 3)

    adj = jax.random.uniform(k_adj, (N, N), dtype=jnp.float32)
    x = jax.random.uniform(k_x, (N, F_IN), dtype=jnp.float32)
    w = jax.random.uniform(k_w, (F_IN, F_OUT), dtype=jnp.float32)  # ~torch.rand

    ref = (adj @ x) @ w

    # Auto path: F_out <= F_in -> adj @ (x @ w), single-K fast kernel,
    # >= 2 row tiles for the parallel M axis.
    gcn_auto = jax.jit(simple_gcn_layer)
    adj_out, out_auto = gcn_auto(adj, x, w)
    jax.block_until_ready(out_auto)
    assert adj_out.dtype == adj.dtype and bool(jnp.array_equal(adj_out, adj)), \
        "adj passthrough changed"
    assert jnp.allclose(out_auto, ref, atol=1e-2, rtol=1e-2), "auto mismatch"

    # Explicit left_to_right override: (adj @ x) @ w computed inside the kernel.
    gcn_l2r = jax.jit(functools.partial(simple_gcn_layer, left_to_right=True))
    _, out_l2r = gcn_l2r(adj, x, w)
    jax.block_until_ready(out_l2r)
    assert jnp.allclose(out_l2r, ref, atol=1e-2, rtol=1e-2), "l2r mismatch"

    # Force the K-tiled accumulator path (2 reduction steps) to exercise the
    # resident-RHS + in-kernel pl.ds slice + pl.when init/finalize machinery.
    gcn_ktiled = jax.jit(functools.partial(simple_gcn_layer,
                                           tile_m=128, tile_k=128))
    _, out_kt = gcn_ktiled(adj, x, w)
    jax.block_until_ready(out_kt)
    assert jnp.allclose(out_kt, ref, atol=1e-2, rtol=1e-2), "k-tiled mismatch"

    print("KERNEL_OK")
</pallas_src>

<mosaic_0001>
module attributes {stable_mosaic.version = 11 : i64} {
  func.func @_gcn_r2l_single(%arg0: i32, %arg1: memref<128x256xf32, #tpu.memory_space<vmem>>, %arg2: memref<256x16xf32, #tpu.memory_space<vmem>>, %arg3: memref<128x16xf32, #tpu.memory_space<vmem>>) attributes {dimension_semantics = [#tpu.dimension_semantics<parallel>], iteration_bounds = array<i64: 2>, scalar_prefetch = 0 : i64, scratch_operands = 0 : i64, tpu.core_type = #tpu.core_type<tc>, window_params = [{transform_indices = @transform_0, window_bounds = array<i64: 128, 256>}, {pipeline_mode = #tpu.pipeline_mode<synchronous>, transform_indices = @transform_1, window_bounds = array<i64: 256, 16>}, {transform_indices = @transform_2, window_bounds = array<i64: 128, 16>}]} {
    %c0 = arith.constant 0 : index
    %c0_0 = arith.constant 0 : index
    %0 = vector.load %arg1[%c0, %c0_0] : memref<128x256xf32, #tpu.memory_space<vmem>>, vector<128x256xf32>
    %c0_1 = arith.constant 0 : index
    %c0_2 = arith.constant 0 : index
    %1 = vector.load %arg2[%c0_1, %c0_2] : memref<256x16xf32, #tpu.memory_space<vmem>>, vector<256x16xf32>
    %cst = arith.constant dense<0.000000e+00> : vector<128x16xf32>
    %2 = tpu.matmul %0, %1, %cst {dimension_numbers = #tpu.dot_dimension_numbers<[1], [0], [0], [1], [0, 0, 1, 1], [], []>} : vector<128x256xf32>, vector<256x16xf32>, vector<128x16xf32> -> vector<128x16xf32>
    %c0_3 = arith.constant 0 : index
    %c0_4 = arith.constant 0 : index
    %3 = vector.load %arg3[%c0_3, %c0_4] : memref<128x16xf32, #tpu.memory_space<vmem>>, vector<128x16xf32>
    tpu.vector_store %arg3[%c0_3, %c0_4], %2 {strides = array<i32>} : memref<128x16xf32, #tpu.memory_space<vmem>>, vector<128x16xf32>,
    return
  }
  func.func @transform_0(%arg0: i32) -> (i32, i32) {
    %c0_i32 = arith.constant 0 : i32
    %c0_i32_0 = arith.constant 0 : i32
    return %arg0, %c0_i32 : i32, i32
  }
  func.func @transform_1(%arg0: i32) -> (i32, i32) {
    %c0_i32 = arith.constant 0 : i32
    %c0_i32_0 = arith.constant 0 : i32
    %c0_i32_1 = arith.constant 0 : i32
    return %c0_i32, %c0_i32_0 : i32, i32
  }
  func.func @transform_2(%arg0: i32) -> (i32, i32) {
    %c0_i32 = arith.constant 0 : i32
    %c0_i32_0 = arith.constant 0 : i32
    return %arg0, %c0_i32 : i32, i32
  }
}

</mosaic_0001>

<bundles_post_ra>
// kernel: simple_gcn_layer.1
= control target key start
LH: loop header
LB: loop body
LE: loop exit
PB: predicated region body
PF: predicated region fallthrough
CT: control target
= control target key end

     0   :  { %7 = vsyncpa [#allocation3], 0  ;;  %s975_s0 = inlined_call_operand.hbm [shape: f32[256,256], index: 0, kind: input, shape index: {}]   ;;  %s976_s1 = inlined_call_operand.vmem [shape: f32[256,16], index: 1, kind: input, shape index: {}]   ;;  %s977_s2 = inlined_call_operand.vmem [shape: f32[256,16], index: 2, kind: output, shape index: {}]  }
   0x1   :  { %9 = vsyncpa [#allocation3 + $0x1], 0  ;;  %s711_s9 = smov 0   ;;  %s713_s10 = smov 0  }
   0x2   :  { %s715_s11 = smov 0   ;;  %s717_s12 = smov 0  }
   0x3 LB: > { %s460_s13 = sadd.s32 4294967295, %s691_s12   ;;  %s731_s14 = sadd.s32 1, %s691_s12   ;;  %s691_s12 = sphi %s717_s12, %s986_s12   ;;  %s687_s11 = sphi %s715_s11, %s985_s11   ;;  %s683_s10 = sphi %s713_s10, %s984_s10   ;;  %s679_s9 = sphi %s711_s9, %s983_s9  }
   0x4   : > { %s19_s15 = ssub.s32 %s691_s12, %s731_s14  ;;  %s22_s16 = sadd.s32 1, %s687_s11 }
   0x5   : > { %p20_p0 = scmp.eq.s32.totalorder %s19_s15, 0  ;;  %p29_p1 = scmp.ne.s32.totalorder %s687_s11, %s683_s10 }
   0x6   : > { %p30_p2 = scmp.eq.s32.totalorder %s691_s12, 0  ;;  %p35_p3 = scmp.ne.s32.totalorder %s683_s10, %s679_s9 }
   0x7   : > { %s741_s17 = scalar_select %p20_p0, %s687_s11, %s22_s16  }
   0x8   : > { %p31_p4 = por %p30_p2, %p29_p1  ;;  %p36_p5 = scmp.eq.s32.totalorder %s460_s13, 0 }
   0x9   : > { %p594_p6 = scmp.lt.s32.totalorder %s691_s12, 2  ;;  %s109_s19 = sand.u32 1, %s687_s11  }
   0xa   : > { %p746_p7 = por %p36_p5, %p35_p3  ;;  %s464_s20 = sshll.u32 %s109_s19, 8 }
   0xb   : > { %s475_s21 = sshll.u32 %s691_s12, 12  ;;  %s113_s25 = scalar_lea.vmem [#allocation2], %s464_s20 }
   0xc   : > { %s979_s18 = scalar_select %p746_p7, 1, 0 }
   0xd   : > { %s755_s24 = scalar_lea.hbm %s975_s0, %s475_s21  ;;  %s121_s26 = sshll.u32 %s113_s25, 4  ;;  %s757_s26 = int_to_ptr.vmem [resolvable:$true] %s121_s26 }
   0xe   : > { %p759_p8 = pnand %p594_p6, %p31_p4  ;;  %s764_s28 = scalar_lea.sflag [#allocation3], %s109_s19 }
   0xf   : > { %s629_s29 = scalar_lea.hbm %s755_s24, 4096  ;;  %s634_s4 = scalar_lea.hbm %s975_s0, 8192 }
  0x10   : > { %p630_p10 = scmp.ne.s32.totalorder %s755_s24, %s629_s29  ;;  %p631_p11 = pneg %p759_p8 }
  0x11   : > { %p635_p0 = scmp.lt.s32.totalorder %s755_s24, %s975_s0  ;;  %p636_p1 = scmp.lt.s32.totalorder %s634_s4, %s629_s29 }
  0x12   : > { %p632_p12 = pnand %p631_p11, %p630_p10 }
  0x13   : > { %p637_p2 = por %p636_p1, %p635_p0 }
  0x14   : > { %p633_p13 = pneg %p632_p12 }
  0x16   : > { %p638_p3 = pnand %p637_p2, %p633_p13 }
  0x18   : > { %641 = shalt.err (!%p638_p3)
}
  0x19   : > { %s642_s7 = scalar_lea.vmem %s757_s26, 4096  ;;  %s693_s8 = smov [#allocation2]  }
  0x1a   : > { %p643_p4 = scmp.ne.s32.totalorder %s757_s26, %s642_s7  ;;  %s647_s9 = sshll.u32 %s693_s8, 4  ;;  %s648_s9 = int_to_ptr.vmem [resolvable:$false] %s647_s9 }
  0x1b   : > { %s649_s15 = scalar_lea.vmem %s648_s9, 8192  ;;  %p650_p10 = scmp.lt.s32.totalorder %s757_s26, %s648_s9 }
  0x1c   : > { %p645_p5 = pnand %p643_p4, %p631_p11  ;;  %p651_p12 = scmp.lt.s32.totalorder %s649_s15, %s642_s7 }
  0x1e   : > { %p646_p6 = pneg %p645_p5  ;;  %p652_p9 = por %p651_p12, %p650_p10 }
  0x20   : > { %p653_p7 = pnand %p652_p9, %p646_p6 }
  0x22   : > { %656 = shalt.err (!%p653_p7)
}
  0x23   : > { %s694_s16 = smov 256   ;;  %s695_s19 = smov 16  }
  0x24   : > { %593 = dma.hbm_to_vmem [thread:$0]  (!%p759_p8), %s755_s24, 4096, %s757_s26, %s764_s28, %s694_s16, %s694_s16, %s695_s19  }
  0x25   : > { %p129_p11 = scmp.lt.s32.totalorder %s691_s12, 3  ;;  %p981_p13 = scmp.ge.s32.totalorder %s691_s12, 1 }
  0x27   : > { %p130_p0 = pnand %p981_p13, %p129_p11 }
  0x28   : > { %s135_s20 = sand.u32 (!%p130_p0), 1, %s683_s10   ;;  %p982_p7 = scmp.ne.s32.totalorder (!%p130_p0), %s979_s18, 0 }
  0x29   : > { %133 = sbr.rel (%p130_p0) target bundleno = 307 (0x133), region = 28  ;;  %s469_s21 = sshll.u32 (!%p130_p0), %s135_s20, 8 }
  0x2a   : > { %s136_s22 = scalar_lea.sflag (!%p130_p0), [#allocation3], %s135_s20  ;;  %s789_s23 = scalar_lea.vmem (!%p130_p0), [#allocation2], %s469_s21 }
  0x2e   : > { %674 = dma.done.wait (%p982_p7), %s136_s22, 4096  }
  0x2f   : > { %676 = vsyncadd (%p982_p7), %s136_s22, 4294963200  ;;  %v230_v0 = vld [vmem:[%s976_s1 + $0xf8] sm:$0xff]  ;;  %v229_v2 = vld [vmem:[%s976_s1 + $0xf0] sm:$0xff]  ;;  %s470_s29 = sshll.u32 %s460_s13, 4  ;;  %vm376_vm0 = vcmask 130048  }
  0x30   : > { %v214_v1 = vld [vmem:[%s976_s1 + $0x78] sm:$0xff]  ;;  %476 = vmatprep.subr.mxu0 %v230_v0  ;;  %556 = vmatprep.subr.mxu1 %v230_v0  ;;  %v213_v3 = vld [vmem:[%s976_s1 + $0x70] sm:$0xff]  ;;  %v228_v4 = vld [vmem:[%s976_s1 + $0xe8] sm:$0xff]  ;;  %p162_p8 = scmp.lt.s32.totalorder %s470_s29, 31 }
  0x31   : > { %477 = vmatpush3.msra.mxu0 %v214_v1  ;;  %572 = vmatpush3.msra.mxu1 %v214_v1  ;;  %v212_v5 = vld [vmem:[%s976_s1 + $0x68] sm:$0xff]  ;;  %v227_v6 = vld [vmem:[%s976_s1 + $0xe0] sm:$0xff]  ;;  %v226_v8 = vld [vmem:[%s976_s1 + $0xd8] sm:$0xff] }
  0x32   : > { %478 = vmatprep.subr.mxu0 %v229_v2  ;;  %557 = vmatprep.subr.mxu1 %v229_v2  ;;  %v211_v7 = vld [vmem:[%s976_s1 + $0x60] sm:$0xff]  ;;  %v210_v9 = vld [vmem:[%s976_s1 + $0x58] sm:$0xff]  ;;  %v225_v10 = vld [vmem:[%s976_s1 + $0xd0] sm:$0xff]  ;;  %s988_s29 = smov (!%p162_p8, %s470_s29), 31 }
  0x33   : > { %479 = vmatpush3.msra.mxu0 %v213_v3  ;;  %573 = vmatpush3.msra.mxu1 %v213_v3  ;;  %v209_v11 = vld [vmem:[%s976_s1 + $0x50] sm:$0xff]  ;;  %v224_v12 = vld [vmem:[%s976_s1 + $0xc8] sm:$0xff]  ;;  %v223_v14 = vld [vmem:[%s976_s1 + $0xc0] sm:$0xff]  ;;  %s471_s24 = sshll.u32 %s988_s29, 3 }
  0x34   : > { %480 = vmatprep.subr.mxu0 %v228_v4  ;;  %558 = vmatprep.subr.mxu1 %v228_v4  ;;  %v208_v13 = vld [vmem:[%s976_s1 + $0x48] sm:$0xff]  ;;  %v207_v15 = vld [vmem:[%s976_s1 + $0x40] sm:$0xff]  ;;  %v222_v16 = vld [vmem:[%s976_s1 + $0xb8] sm:$0xff]  ;;  %s928_s28 = scalar_lea.vmem %s977_s2, %s471_s24 }
  0x35   : > { %481 = vmatpush3.msra.mxu0 %v212_v5  ;;  %574 = vmatpush3.msra.mxu1 %v212_v5  ;;  %v206_v17 = vld [vmem:[%s976_s1 + $0x38] sm:$0xff]  ;;  %v221_v18 = vld [vmem:[%s976_s1 + $0xb0] sm:$0xff]  ;;  %v220_v20 = vld [vmem:[%s976_s1 + $0xa8] sm:$0xff] }
  0x36   : > { %482 = vmatprep.subr.mxu0 %v227_v6  ;;  %559 = vmatprep.subr.mxu1 %v227_v6  ;;  %v205_v19 = vld [vmem:[%s976_s1 + $0x30] sm:$0xff]  ;;  %v204_v21 = vld [vmem:[%s976_s1 + $0x28] sm:$0xff]  ;;  %v219_v22 = vld [vmem:[%s976_s1 + $0xa0] sm:$0xff] }
  0x37   : > { %483 = vmatpush3.msra.mxu0 %v211_v7  ;;  %575 = vmatpush3.msra.mxu1 %v211_v7  ;;  %v203_v23 = vld [vmem:[%s976_s1 + $0x20] sm:$0xff]  ;;  %v218_v24 = vld [vmem:[%s976_s1 + $0x98] sm:$0xff]  ;;  %v217_v26 = vld [vmem:[%s976_s1 + $0x90] sm:$0xff] }
  0x38   : > { %484 = vmatprep.subr.mxu0 %v226_v8  ;;  %560 = vmatprep.subr.mxu1 %v226_v8  ;;  %v202_v25 = vld [vmem:[%s976_s1 + $0x18] sm:$0xff]  ;;  %v201_v27 = vld [vmem:[%s976_s1 + $0x10] sm:$0xff]  ;;  %v216_v28 = vld [vmem:[%s976_s1 + $0x88] sm:$0xff] }
  0x39   : > { %485 = vmatpush3.msra.mxu0 %v210_v9  ;;  %576 = vmatpush3.msra.mxu1 %v210_v9  ;;  %v200_v29 = vld [vmem:[%s976_s1 + $0x8] sm:$0xff]  ;;  %v215_v30 = vld [vmem:[%s976_s1 + $0x80] sm:$0xff]  ;;  %v170_v36 = vld [vmem:[%s789_s23 + $0x18] sm:$0xff] }
  0x3a   : > { %486 = vmatprep.subr.mxu0 %v225_v10  ;;  %561 = vmatprep.subr.mxu1 %v225_v10  ;;  %v199_v31 = vld [vmem:[%s976_s1] sm:$0xff]  ;;  %v168_v32 = vld [vmem:[%s789_s23 + $0x8] sm:$0xff]  ;;  %v186_v37 = vld [vmem:[%s789_s23 + $0x98] sm:$0xff] }
  0x3b   : > { %487 = vmatpush3.msra.mxu0 %v209_v11  ;;  %577 = vmatpush3.msra.mxu1 %v209_v11  ;;  %v184_v33 = vld [vmem:[%s789_s23 + $0x88] sm:$0xff]  ;;  %v167_v34 = vld [vmem:[%s789_s23] sm:$0xff]  ;;  %v169_v38 = vld [vmem:[%s789_s23 + $0x10] sm:$0xff] }
  0x3c   : > { %488 = vmatprep.subr.mxu0 %v224_v12  ;;  %562 = vmatprep.subr.mxu1 %v224_v12  ;;  %v183_v35 = vld [vmem:[%s789_s23 + $0x80] sm:$0xff]  ;;  %v185_v39 = vld [vmem:[%s789_s23 + $0x90] sm:$0xff]  ;;  %v172_v40 = vld [vmem:[%s789_s23 + $0x28] sm:$0xff] }
  0x3d   : > { %489 = vmatpush3.msra.mxu0 %v208_v13  ;;  %578 = vmatpush3.msra.mxu1 %v208_v13  ;;  %v188_v41 = vld [vmem:[%s789_s23 + $0xa8] sm:$0xff]  ;;  %v171_v42 = vld [vmem:[%s789_s23 + $0x20] sm:$0xff]  ;;  %v174_v44 = vld [vmem:[%s789_s23 + $0x38] sm:$0xff] }
  0x3e   : > { %490 = vmatprep.subr.mxu0 %v223_v14  ;;  %563 = vmatprep.subr.mxu1 %v223_v14  ;;  %v187_v43 = vld [vmem:[%s789_s23 + $0xa0] sm:$0xff]  ;;  %v190_v45 = vld [vmem:[%s789_s23 + $0xb8] sm:$0xff]  ;;  %v173_v46 = vld [vmem:[%s789_s23 + $0x30] sm:$0xff] }
  0x3f   : > { %491 = vmatpush3.msra.mxu0 %v207_v15  ;;  %579 = vmatpush3.msra.mxu1 %v207_v15  ;;  %v189_v47 = vld [vmem:[%s789_s23 + $0xb0] sm:$0xff]  ;;  %v176_v48 = vld [vmem:[%s789_s23 + $0x48] sm:$0xff]  ;;  %v175_v50 = vld [vmem:[%s789_s23 + $0x40] sm:$0xff] }
  0x40   : > { %492 = vmatprep.subr.mxu0 %v222_v16  ;;  %564 = vmatprep.subr.mxu1 %v222_v16  ;;  %v192_v49 = vld [vmem:[%s789_s23 + $0xc8] sm:$0xff]  ;;  %v191_v51 = vld [vmem:[%s789_s23 + $0xc0] sm:$0xff]  ;;  %v178_v52 = vld [vmem:[%s789_s23 + $0x58] sm:$0xff] }
  0x41   : > { %493 = vmatpush3.msra.mxu0 %v206_v17  ;;  %580 = vmatpush3.msra.mxu1 %v206_v17  ;;  %v194_v53 = vld [vmem:[%s789_s23 + $0xd8] sm:$0xff]  ;;  %v177_v54 = vld [vmem:[%s789_s23 + $0x50] sm:$0xff]  ;;  %v180_v56 = vld [vmem:[%s789_s23 + $0x68] sm:$0xff] }
  0x42   : > { %494 = vmatprep.subr.mxu0 %v221_v18  ;;  %565 = vmatprep.subr.mxu1 %v221_v18  ;;  %v193_v55 = vld [vmem:[%s789_s23 + $0xd0] sm:$0xff]  ;;  %v196_v57 = vld [vmem:[%s789_s23 + $0xe8] sm:$0xff]  ;;  %v179_v58 = vld [vmem:[%s789_s23 + $0x60] sm:$0xff] }
  0x43   : > { %495 = vmatpush3.msra.mxu0 %v205_v19  ;;  %581 = vmatpush3.msra.mxu1 %v205_v19  ;;  %v195_v59 = vld [vmem:[%s789_s23 + $0xe0] sm:$0xff]  ;;  %v182_v60 = vld [vmem:[%s789_s23 + $0x78] sm:$0xff]  ;;  %v181_v62 = vld [vmem:[%s789_s23 + $0x70] sm:$0xff] }
  0x44   : > { %496 = vmatprep.subr.mxu0 %v220_v20  ;;  %566 = vmatprep.subr.mxu1 %v220_v20  ;;  %v198_v61 = vld [vmem:[%s789_s23 + $0xf8] sm:$0xff]  ;;  %v197_v63 = vld [vmem:[%s789_s23 + $0xf0] sm:$0xff] }
  0x45   : > { %497 = vmatpush3.msra.mxu0 %v204_v21  ;;  %582 = vmatpush3.msra.mxu1 %v204_v21 }
  0x46   : > { %498 = vmatprep.subr.mxu0 %v219_v22  ;;  %567 = vmatprep.subr.mxu1 %v219_v22 }
  0x47   : > { %499 = vmatpush3.msra.mxu0 %v203_v23  ;;  %583 = vmatpush3.msra.mxu1 %v203_v23 }
  0x48   : > { %500 = vmatprep.subr.mxu0 %v218_v24  ;;  %568 = vmatprep.subr.mxu1 %v218_v24 }
  0x49   : > { %501 = vmatpush3.msra.mxu0 %v202_v25  ;;  %584 = vmatpush3.msra.mxu1 %v202_v25 }
  0x4a   : > { %502 = vmatprep.subr.mxu0 %v217_v26  ;;  %569 = vmatprep.subr.mxu1 %v217_v26 }
  0x4b   : > { %503 = vmatpush3.msra.mxu0 %v201_v27  ;;  %585 = vmatpush3.msra.mxu1 %v201_v27 }
  0x4c   : > { %504 = vmatprep.subr.mxu0 %v216_v28  ;;  %570 = vmatprep.subr.mxu1 %v216_v28 }
  0x4d   : > { %505 = vmatpush3.msra.mxu0 %v200_v29  ;;  %586 = vmatpush3.msra.mxu1 %v200_v29 }
  0x4e   : > { %506 = vmatprep.subr.mxu0 %v215_v30  ;;  %571 = vmatprep.subr.mxu1 %v215_v30 }
  0x4f   : > { %507 = vmatpush3.msra.mxu0 %v199_v31  ;;  %587 = vmatpush3.msra.mxu1 %v199_v31 }
  0x50   : > { %295 = vmatprep.mubr.f32.mxu0 %v168_v32  ;;  %335 = vmatprep.mubr.f32.mxu1 %v184_v33 }
  0x51   : > { %296 = vmatmul.mubr.f32.vlgmr.msra.gmra.mxu0 %v167_v34  ;;  %336 = vmatmul.mubr.f32.vlgmr.msra.gmra.mxu1 %v183_v35 }
  0x52   : > { %300 = vmatprep.mubr.f32.mxu0 %v170_v36  ;;  %340 = vmatprep.mubr.f32.mxu1 %v186_v37 }
  0x55   : > { %301 = vmatmul.mubr.f32.gmra.mxu0 %v169_v38  ;;  %341 = vmatmul.mubr.f32.gmra.mxu1 %v185_v39 }
  0x56   : > { %305 = vmatprep.mubr.f32.mxu0 %v172_v40  ;;  %345 = vmatprep.mubr.f32.mxu1 %v188_v41 }
  0x59   : > { %306 = vmatmul.mubr.f32.gmra.mxu0 %v171_v42  ;;  %346 = vmatmul.mubr.f32.gmra.mxu1 %v187_v43 }
  0x5a   : > { %310 = vmatprep.mubr.f32.mxu0 %v174_v44  ;;  %350 = vmatprep.mubr.f32.mxu1 %v190_v45 }
  0x5d   : > { %311 = vmatmul.mubr.f32.gmra.mxu0 %v173_v46  ;;  %351 = vmatmul.mubr.f32.gmra.mxu1 %v189_v47 }
  0x5e   : > { %315 = vmatprep.mubr.f32.mxu0 %v176_v48  ;;  %355 = vmatprep.mubr.f32.mxu1 %v192_v49 }
  0x61   : > { %316 = vmatmul.mubr.f32.gmra.mxu0 %v175_v50  ;;  %356 = vmatmul.mubr.f32.gmra.mxu1 %v191_v51 }
  0x62   : > { %320 = vmatprep.mubr.f32.mxu0 %v178_v52  ;;  %360 = vmatprep.mubr.f32.mxu1 %v194_v53 }
  0x65   : > { %321 = vmatmul.mubr.f32.gmra.mxu0 %v177_v54  ;;  %361 = vmatmul.mubr.f32.gmra.mxu1 %v193_v55 }
  0x66   : > { %325 = vmatprep.mubr.f32.mxu0 %v180_v56  ;;  %365 = vmatprep.mubr.f32.mxu1 %v196_v57 }
  0x69   : > { %326 = vmatmul.mubr.f32.gmra.mxu0 %v179_v58  ;;  %366 = vmatmul.mubr.f32.gmra.mxu1 %v195_v59 }
  0x6a   : > { %330 = vmatprep.mubr.f32.mxu0 %v182_v60  ;;  %370 = vmatprep.mubr.f32.mxu1 %v198_v61 }
  0x6d   : > { %331 = vmatmul.mubr.f32.gmra.mxu0 %v181_v62  ;;  %371 = vmatmul.mubr.f32.gmra.mxu1 %v197_v63 }
 0x111   : > { %v508_v0 = vpop.f32.mrf.mxu0  ;;  %v532_v1 = vpop.f32.mrf.mxu1 }
 0x113   : > { %v509_v2 = vpop.f32.mrf.mxu0  ;;  %v533_v3 = vpop.f32.mrf.mxu1 }
 0x114   : > { %v510_v4 = vadd.f32 %v509_v2, %v508_v0  ;;  %v534_v5 = vadd.f32 %v533_v3, %v532_v1 }
 0x115   : > { %v511_v6 = vpop.f32.mrf.mxu0  ;;  %v535_v7 = vpop.f32.mrf.mxu1 }
 0x116   : > { %377 = vst.msk [vmem:[%s928_s28] sm:$0xff] %vm376_vm0, %v510_v4  ;;  %385 = vst.msk [vmem:[%s928_s28 + $0x40] sm:$0xff] %vm376_vm0, %v534_v5 }
 0x117   : > { %v512_v8 = vpop.f32.mrf.mxu0  ;;  %v536_v9 = vpop.f32.mrf.mxu1 }
 0x118   : > { %v513_v10 = vadd.f32 %v512_v8, %v511_v6  ;;  %v537_v11 = vadd.f32 %v536_v9, %v535_v7 }
 0x119   : > { %v514_v12 = vpop.f32.mrf.mxu0  ;;  %v538_v13 = vpop.f32.mrf.mxu1 }
 0x11a   : > { %378 = vst.msk [vmem:[%s928_s28 + $0x8] sm:$0xff] %vm376_vm0, %v513_v10  ;;  %386 = vst.msk [vmem:[%s928_s28 + $0x48] sm:$0xff] %vm376_vm0, %v537_v11 }
 0x11b   : > { %v515_v14 = vpop.f32.mrf.mxu0  ;;  %v539_v15 = vpop.f32.mrf.mxu1 }
 0x11c   : > { %v516_v16 = vadd.f32 %v515_v14, %v514_v12  ;;  %v540_v17 = vadd.f32 %v539_v15, %v538_v13 }
 0x11d   : > { %v517_v18 = vpop.f32.mrf.mxu0  ;;  %v541_v19 = vpop.f32.mrf.mxu1 }
 0x11e   : > { %379 = vst.msk [vmem:[%s928_s28 + $0x10] sm:$0xff] %vm376_vm0, %v516_v16  ;;  %387 = vst.msk [vmem:[%s928_s28 + $0x50] sm:$0xff] %vm376_vm0, %v540_v17 }
 0x11f   : > { %v518_v20 = vpop.f32.mrf.mxu0  ;;  %v542_v21 = vpop.f32.mrf.mxu1 }
 0x120   : > { %v519_v22 = vadd.f32 %v518_v20, %v517_v18  ;;  %v543_v23 = vadd.f32 %v542_v21, %v541_v19 }
 0x121   : > { %v520_v24 = vpop.f32.mrf.mxu0  ;;  %v544_v25 = vpop.f32.mrf.mxu1 }
 0x122   : > { %380 = vst.msk [vmem:[%s928_s28 + $0x18] sm:$0xff] %vm376_vm0, %v519_v22  ;;  %388 = vst.msk [vmem:[%s928_s28 + $0x58] sm:$0xff] %vm376_vm0, %v543_v23 }
 0x123   : > { %v521_v26 = vpop.f32.mrf.mxu0  ;;  %v545_v27 = vpop.f32.mrf.mxu1 }
 0x124   : > { %v522_v28 = vadd.f32 %v521_v26, %v520_v24  ;;  %v546_v29 = vadd.f32 %v545_v27, %v544_v25 }
 0x125   : > { %v523_v30 = vpop.f32.mrf.mxu0  ;;  %v547_v31 = vpop.f32.mrf.mxu1 }
 0x126   : > { %381 = vst.msk [vmem:[%s928_s28 + $0x20] sm:$0xff] %vm376_vm0, %v522_v28  ;;  %389 = vst.msk [vmem:[%s928_s28 + $0x60] sm:$0xff] %vm376_vm0, %v546_v29 }
 0x127   : > { %v524_v32 = vpop.f32.mrf.mxu0  ;;  %v548_v33 = vpop.f32.mrf.mxu1 }
 0x128   : > { %v525_v34 = vadd.f32 %v524_v32, %v523_v30  ;;  %v549_v35 = vadd.f32 %v548_v33, %v547_v31 }
 0x129   : > { %v526_v36 = vpop.f32.mrf.mxu0  ;;  %v550_v37 = vpop.f32.mrf.mxu1 }
 0x12a   : > { %382 = vst.msk [vmem:[%s928_s28 + $0x28] sm:$0xff] %vm376_vm0, %v525_v34  ;;  %390 = vst.msk [vmem:[%s928_s28 + $0x68] sm:$0xff] %vm376_vm0, %v549_v35 }
 0x12b   : > { %v527_v38 = vpop.f32.mrf.mxu0  ;;  %v551_v39 = vpop.f32.mrf.mxu1 }
 0x12c   : > { %v528_v40 = vadd.f32 %v527_v38, %v526_v36  ;;  %v552_v41 = vadd.f32 %v551_v39, %v550_v37 }
 0x12d   : > { %v529_v42 = vpop.f32.mrf.mxu0  ;;  %v553_v43 = vpop.f32.mrf.mxu1 }
 0x12e   : > { %383 = vst.msk [vmem:[%s928_s28 + $0x30] sm:$0xff] %vm376_vm0, %v528_v40  ;;  %391 = vst.msk [vmem:[%s928_s28 + $0x70] sm:$0xff] %vm376_vm0, %v552_v41 }
 0x12f   : > { %v530_v44 = vpop.f32.mrf.mxu0  ;;  %v554_v45 = vpop.f32.mrf.mxu1 }
 0x130   : > { %v531_v46 = vadd.f32 %v530_v44, %v529_v42  ;;  %v555_v47 = vadd.f32 %v554_v45, %v553_v43 }
 0x132   : > { %384 = vst.msk [vmem:[%s928_s28 + $0x38] sm:$0xff] %vm376_vm0, %v531_v46  ;;  %392 = vst.msk [vmem:[%s928_s28 + $0x78] sm:$0xff] %vm376_vm0, %v555_v47 }
 0x133 PF: > { %p12_p9 = scmp.ge.s32.totalorder %s731_s14, 4   ;;  %s983_s9 = smov %s683_s10 }
 0x134   : > { %s984_s10 = smov %s687_s11  ;;  %s985_s11 = smov %s741_s17 }
 0x135   : > { %s986_s12 = smov %s731_s14  ;;  %14 = sbr.rel (!%p12_p9) target bundleno = 3 (0x3), region = 68 }
 0x13a   :  { %415 = vsyncpa [#allocation3], 1 }
 0x13b   :  { %417 = vsyncpa [#allocation3 + $0x1], 1 }

</bundles_post_ra>
